<compile_context>
chip_gen: v7x
topology: tpu7x:2x2x1
jax: 0.10.0
libtpu: 0.0.40
codegen_flags: <defaults>
</compile_context>

<pallas_src>
import functools

import jax
import jax.numpy as jnp
from jax.experimental import pallas as pl
from jax.experimental.pallas import tpu as pltpu


def _round_up(x: int, m: int) -> int:
    return (x + m - 1) // m * m


def mlp_kernel(x_ref, w1_ref, b1_ref, w2_ref, b2_ref, w3_ref, b3_ref, o_ref):
    # layer1: Linear(in_dim, 2*n_hidden) + ReLU  (f32 accumulate on the MXU)
    h1 = jnp.dot(x_ref[...], w1_ref[...], preferred_element_type=jnp.float32)
    h1 = jnp.maximum(h1 + b1_ref[...], 0.0)
    # layer3: Linear(2*n_hidden, n_hidden) + ReLU
    h2 = jnp.dot(h1.astype(w2_ref.dtype), w2_ref[...],
                 preferred_element_type=jnp.float32)
    h2 = jnp.maximum(h2 + b2_ref[...], 0.0)
    # layer4: Linear(n_hidden, out_dim) + sigmoid (f32 elementwise everywhere)
    z = jnp.dot(h2.astype(w3_ref.dtype), w3_ref[...],
                preferred_element_type=jnp.float32) + b3_ref[...]
    o_ref[...] = jax.nn.sigmoid(z)


def _pad2d(a, rows, cols):
    return jnp.pad(a, ((0, rows - a.shape[0]), (0, cols - a.shape[1])))


@functools.partial(jax.jit, static_argnames=("tile_b", "use_bf16"))
def neuralnetwork_forward(x, params, *, tile_b: int = 1024, use_bf16: bool = False):
    """Pallas implementation of Neuralnetwork.forward.

    Returns (x_sol, x_penalty), matching the PyTorch module signature.
    """
    (w1, b1), (w2, b2), (w3, b3) = params
    B, in_dim = x.shape
    h1_dim = w1.shape[1]
    h2_dim = w2.shape[1]
    out_dim = w3.shape[1]

    # --- lane-pad all feature dims to multiples of 128 (zero padding). ---
    in_p = _round_up(in_dim, 128)
    h1_p = _round_up(h1_dim, 128)
    h2_p = _round_up(h2_dim, 128)
    out_p = _round_up(out_dim, 128)

    # --- batch tiling: large tile, but keep >=2 grid blocks when possible ---
    # (so dimension_semantics=("parallel",) can shard across v7x's 2 TCs).
    tile_b = min(tile_b, max(8, _round_up(pl.cdiv(B, 2), 8)))
    Bp = _round_up(B, tile_b)
    grid = (Bp // tile_b,)

    compute_dtype = jnp.bfloat16 if use_bf16 else jnp.float32

    xp = _pad2d(x, Bp, in_p).astype(compute_dtype)
    w1p = _pad2d(w1, in_p, h1_p).astype(compute_dtype)
    w2p = _pad2d(w2, h1_p, h2_p).astype(compute_dtype)
    w3p = _pad2d(w3, h2_p, out_p).astype(compute_dtype)
    # Biases stay f32 (elementwise math in f32 on every generation).
    b1p = _pad2d(b1, 1, h1_p).astype(jnp.float32)
    b2p = _pad2d(b2, 1, h2_p).astype(jnp.float32)
    b3p = _pad2d(b3, 1, out_p).astype(jnp.float32)

    bytes_per_el = 2 if use_bf16 else 4
    cost = pl.CostEstimate(
        flops=2 * Bp * (in_p * h1_p + h1_p * h2_p + h2_p * out_p),
        transcendentals=Bp * out_p,  # sigmoid
        bytes_accessed=(Bp * in_p + in_p * h1_p + h1_p * h2_p + h2_p * out_p)
        * bytes_per_el
        + (h1_p + h2_p + out_p) * 4
        + Bp * out_p * 4,
    )

    x_sol_p = pl.pallas_call(
        mlp_kernel,
        out_shape=jax.ShapeDtypeStruct((Bp, out_p), jnp.float32),
        grid_spec=pltpu.PrefetchScalarGridSpec(
            num_scalar_prefetch=0,
            grid=grid,
            in_specs=[
                pl.BlockSpec((tile_b, in_p), lambda i: (i, 0)),
                pl.BlockSpec((in_p, h1_p), lambda i: (0, 0)),
                pl.BlockSpec((1, h1_p), lambda i: (0, 0)),
                pl.BlockSpec((h1_p, h2_p), lambda i: (0, 0)),
                pl.BlockSpec((1, h2_p), lambda i: (0, 0)),
                pl.BlockSpec((h2_p, out_p), lambda i: (0, 0)),
                pl.BlockSpec((1, out_p), lambda i: (0, 0)),
            ],
            out_specs=pl.BlockSpec((tile_b, out_p), lambda i: (i, 0)),
        ),
        compiler_params=pltpu.CompilerParams(
            dimension_semantics=("parallel",)),
        cost_estimate=cost,
    )(xp, w1p, b1p, w2p, b2p, w3p, b3p)

    # Slice away the batch / lane padding.
    x_sol = x_sol_p[:B, :out_dim]

    # TODO(synk): Penalty_ACPF (layer6) runs an external AC power-flow solver
    # (pypower runpf) on CPU via multiprocessing — no Pallas/TPU equivalent;
    # returning a zero scalar placeholder for the penalty output.
    x_penalty = jnp.float32(0.0)
    return x_sol, x_penalty


def init_params(key, in_dim, n_hidden, out_dim):
    """Deterministic parameter init (shapes match the nn.Linear layers)."""
    ks = jax.random.split(key, 6)

    def linear(kw, kb, fan_in, fan_out):
        bound = 1.0 / jnp.sqrt(jnp.float32(fan_in))
        w = jax.random.uniform(kw, (fan_in, fan_out), jnp.float32, -bound, bound)
        b = jax.random.uniform(kb, (1, fan_out), jnp.float32, -bound, bound)
        return w, b

    p1 = linear(ks[0], ks[1], in_dim, 2 * n_hidden)       # layer1
    p2 = linear(ks[2], ks[3], 2 * n_hidden, n_hidden)     # layer3
    p3 = linear(ks[4], ks[5], n_hidden, out_dim)          # layer4
    return (p1, p2, p3)


if __name__ == "__main__":
    in_dim, n_hidden, out_dim = 32, 32, 16
    batch = 8

    key = jax.random.PRNGKey(0)
    k_x, k_p = jax.random.split(key)
    x = jax.random.normal(k_x, (batch, in_dim), jnp.float32)
    params = init_params(k_p, in_dim, n_hidden, out_dim)

    x_sol, x_penalty = neuralnetwork_forward(x, params)
    jax.block_until_ready(x_sol)
    jax.block_until_ready(x_penalty)

    # Reference check in plain JAX (same math as the PyTorch forward).
    (w1, b1), (w2, b2), (w3, b3) = params
    h1 = jnp.maximum(x @ w1 + b1, 0.0)
    h2 = jnp.maximum(h1 @ w2 + b2, 0.0)
    ref = jax.nn.sigmoid(h2 @ w3 + b3)
    assert x_sol.shape == (batch, out_dim)
    assert jnp.allclose(x_sol, ref, atol=1e-5, rtol=1e-5)

    print("KERNEL_OK")
</pallas_src>

<mosaic_0001>
module attributes {stable_mosaic.version = 11 : i64} {
  func.func @mlp_kernel(%arg0: i32, %arg1: memref<8x128xf32, #tpu.memory_space<vmem>>, %arg2: memref<128x128xf32, #tpu.memory_space<vmem>>, %arg3: memref<1x128xf32, #tpu.memory_space<vmem>>, %arg4: memref<128x128xf32, #tpu.memory_space<vmem>>, %arg5: memref<1x128xf32, #tpu.memory_space<vmem>>, %arg6: memref<128x128xf32, #tpu.memory_space<vmem>>, %arg7: memref<1x128xf32, #tpu.memory_space<vmem>>, %arg8: memref<8x128xf32, #tpu.memory_space<vmem>>) attributes {dimension_semantics = [#tpu.dimension_semantics<parallel>], iteration_bounds = array<i64: 1>, scalar_prefetch = 0 : i64, scratch_operands = 0 : i64, tpu.core_type = #tpu.core_type<tc>, window_params = [{transform_indices = @transform_0, window_bounds = array<i64: 8, 128>}, {pipeline_mode = #tpu.pipeline_mode<synchronous>, transform_indices = @transform_1, window_bounds = array<i64: 128, 128>}, {pipeline_mode = #tpu.pipeline_mode<synchronous>, transform_indices = @transform_2, window_bounds = array<i64: 1, 128>}, {pipeline_mode = #tpu.pipeline_mode<synchronous>, transform_indices = @transform_3, window_bounds = array<i64: 128, 128>}, {pipeline_mode = #tpu.pipeline_mode<synchronous>, transform_indices = @transform_4, window_bounds = array<i64: 1, 128>}, {pipeline_mode = #tpu.pipeline_mode<synchronous>, transform_indices = @transform_5, window_bounds = array<i64: 128, 128>}, {pipeline_mode = #tpu.pipeline_mode<synchronous>, transform_indices = @transform_6, window_bounds = array<i64: 1, 128>}, {transform_indices = @transform_7, window_bounds = array<i64: 8, 128>}]} {
    %c0 = arith.constant 0 : index
    %c0_0 = arith.constant 0 : index
    %0 = vector.load %arg1[%c0, %c0_0] : memref<8x128xf32, #tpu.memory_space<vmem>>, vector<8x128xf32>
    %c0_1 = arith.constant 0 : index
    %c0_2 = arith.constant 0 : index
    %1 = vector.load %arg2[%c0_1, %c0_2] : memref<128x128xf32, #tpu.memory_space<vmem>>, vector<128x128xf32>
    %cst = arith.constant dense<0.000000e+00> : vector<8x128xf32>
    %2 = tpu.matmul %0, %1, %cst {dimension_numbers = #tpu.dot_dimension_numbers<[1], [0], [0], [1], [0, 0, 1, 1], [], []>} : vector<8x128xf32>, vector<128x128xf32>, vector<8x128xf32> -> vector<8x128xf32>
    %c0_3 = arith.constant 0 : index
    %c0_4 = arith.constant 0 : index
    %3 = vector.load %arg3[%c0_3, %c0_4] : memref<1x128xf32, #tpu.memory_space<vmem>>, vector<1x128xf32>
    %4 = vector.broadcast %3 : vector<1x128xf32> to vector<8x128xf32>
    %5 = arith.addf %2, %4 : vector<8x128xf32>
    %cst_5 = arith.constant 0.000000e+00 : f32
    %6 = vector.broadcast %cst_5 : f32 to vector<8x128xf32>
    %7 = arith.maximumf %5, %6 : vector<8x128xf32>
    %c0_6 = arith.constant 0 : index
    %c0_7 = arith.constant 0 : index
    %8 = vector.load %arg4[%c0_6, %c0_7] : memref<128x128xf32, #tpu.memory_space<vmem>>, vector<128x128xf32>
    %cst_8 = arith.constant dense<0.000000e+00> : vector<8x128xf32>
    %9 = tpu.matmul %7, %8, %cst_8 {dimension_numbers = #tpu.dot_dimension_numbers<[1], [0], [0], [1], [0, 0, 1, 1], [], []>} : vector<8x128xf32>, vector<128x128xf32>, vector<8x128xf32> -> vector<8x128xf32>
    %c0_9 = arith.constant 0 : index
    %c0_10 = arith.constant 0 : index
    %10 = vector.load %arg5[%c0_9, %c0_10] : memref<1x128xf32, #tpu.memory_space<vmem>>, vector<1x128xf32>
    %11 = vector.broadcast %10 : vector<1x128xf32> to vector<8x128xf32>
    %12 = arith.addf %9, %11 : vector<8x128xf32>
    %cst_11 = arith.constant 0.000000e+00 : f32
    %13 = vector.broadcast %cst_11 : f32 to vector<8x128xf32>
    %14 = arith.maximumf %12, %13 : vector<8x128xf32>
    %c0_12 = arith.constant 0 : index
    %c0_13 = arith.constant 0 : index
    %15 = vector.load %arg6[%c0_12, %c0_13] : memref<128x128xf32, #tpu.memory_space<vmem>>, vector<128x128xf32>
    %cst_14 = arith.constant dense<0.000000e+00> : vector<8x128xf32>
    %16 = tpu.matmul %14, %15, %cst_14 {dimension_numbers = #tpu.dot_dimension_numbers<[1], [0], [0], [1], [0, 0, 1, 1], [], []>} : vector<8x128xf32>, vector<128x128xf32>, vector<8x128xf32> -> vector<8x128xf32>
    %c0_15 = arith.constant 0 : index
    %c0_16 = arith.constant 0 : index
    %17 = vector.load %arg7[%c0_15, %c0_16] : memref<1x128xf32, #tpu.memory_space<vmem>>, vector<1x128xf32>
    %18 = vector.broadcast %17 : vector<1x128xf32> to vector<8x128xf32>
    %19 = arith.addf %16, %18 : vector<8x128xf32>
    %20 = arith.negf %19 : vector<8x128xf32>
    %21 = math.exp %20 : vector<8x128xf32>
    %cst_17 = arith.constant 1.000000e+00 : f32
    %22 = vector.broadcast %cst_17 : f32 to vector<8x128xf32>
    %23 = arith.addf %22, %21 : vector<8x128xf32>
    %24 = arith.divf %22, %23 : vector<8x128xf32>
    %c0_18 = arith.constant 0 : index
    %c0_19 = arith.constant 0 : index
    %25 = vector.load %arg8[%c0_18, %c0_19] : memref<8x128xf32, #tpu.memory_space<vmem>>, vector<8x128xf32>
    tpu.vector_store %arg8[%c0_18, %c0_19], %24 {strides = array<i32>} : memref<8x128xf32, #tpu.memory_space<vmem>>, vector<8x128xf32>,
    return
  }
  func.func @transform_0(%arg0: i32) -> (i32, i32) {
    %c0_i32 = arith.constant 0 : i32
    %c0_i32_0 = arith.constant 0 : i32
    return %arg0, %c0_i32 : i32, i32
  }
  func.func @transform_1(%arg0: i32) -> (i32, i32) {
    %c0_i32 = arith.constant 0 : i32
    %c0_i32_0 = arith.constant 0 : i32
    %c0_i32_1 = arith.constant 0 : i32
    return %c0_i32, %c0_i32_0 : i32, i32
  }
  func.func @transform_2(%arg0: i32) -> (i32, i32) {
    %c0_i32 = arith.constant 0 : i32
    %c0_i32_0 = arith.constant 0 : i32
    %c0_i32_1 = arith.constant 0 : i32
    return %c0_i32, %c0_i32_0 : i32, i32
  }
  func.func @transform_3(%arg0: i32) -> (i32, i32) {
    %c0_i32 = arith.constant 0 : i32
    %c0_i32_0 = arith.constant 0 : i32
    %c0_i32_1 = arith.constant 0 : i32
    return %c0_i32, %c0_i32_0 : i32, i32
  }
  func.func @transform_4(%arg0: i32) -> (i32, i32) {
    %c0_i32 = arith.constant 0 : i32
    %c0_i32_0 = arith.constant 0 : i32
    %c0_i32_1 = arith.constant 0 : i32
    return %c0_i32, %c0_i32_0 : i32, i32
  }
  func.func @transform_5(%arg0: i32) -> (i32, i32) {
    %c0_i32 = arith.constant 0 : i32
    %c0_i32_0 = arith.constant 0 : i32
    %c0_i32_1 = arith.constant 0 : i32
    return %c0_i32, %c0_i32_0 : i32, i32
  }
  func.func @transform_6(%arg0: i32) -> (i32, i32) {
    %c0_i32 = arith.constant 0 : i32
    %c0_i32_0 = arith.constant 0 : i32
    %c0_i32_1 = arith.constant 0 : i32
    return %c0_i32, %c0_i32_0 : i32, i32
  }
  func.func @transform_7(%arg0: i32) -> (i32, i32) {
    %c0_i32 = arith.constant 0 : i32
    %c0_i32_0 = arith.constant 0 : i32
    return %arg0, %c0_i32 : i32, i32
  }
}

</mosaic_0001>

<bundles_post_ra>
// kernel: neuralnetwork_forward.1
= control target key start
LH: loop header
LB: loop body
LE: loop exit
PB: predicated region body
PF: predicated region fallthrough
CT: control target
= control target key end

     0   :  { %v594_v3 = vmov 0.0|0.0   ;;  %vm595_vm0 = vmmov 0   ;;  %v596_v6 = vmov 0.0   ;;  %s836_s0 = inlined_call_operand.vmem [shape: f32[8,128], index: 0, kind: input, shape index: {}]   ;;  %s837_s1 = inlined_call_operand.vmem [shape: f32[128,128], index: 1, kind: input, shape index: {}]   ;;  %s838_s2 = inlined_call_operand.vmem [shape: f32[1,128], index: 2, kind: input, shape index: {}]   ;;  %s839_s3 = inlined_call_operand.vmem [shape: f32[128,128], index: 3, kind: input, shape index: {}]   ;;  %s840_s4 = inlined_call_operand.vmem [shape: f32[1,128], index: 4, kind: input, shape index: {}]   ;;  %s841_s5 = inlined_call_operand.vmem [shape: f32[128,128], index: 5, kind: input, shape index: {}]   ;;  %s842_s6 = inlined_call_operand.vmem [shape: f32[1,128], index: 6, kind: input, shape index: {}]   ;;  %s843_s7 = inlined_call_operand.hbm [shape: f32[8,128], index: 7, kind: output, shape index: {}]  }
   0x1   :  { %v28_v0 = vld [vmem:[%s837_s1] sm:$0xff]  ;;  %v29_v1 = vld [vmem:[%s837_s1 + $0x8] sm:$0xff]  ;;  %v30_v2 = vld [vmem:[%s837_s1 + $0x10] sm:$0xff]  ;;  %490 = vmatprep.subr.bf16.mxu0 %v594_v3  ;;  %417 = vmatprep.mubr.msk.f32.mxu0 %vm595_vm0, %v596_v6 }
   0x2   :  { %v491_v4 = vpack.c.bf16 %v29_v1, %v28_v0  ;;  %v31_v5 = vld [vmem:[%s837_s1 + $0x18] sm:$0xff]  ;;  %514 = vmatprep.subr.bf16.mxu1 %v594_v3  ;;  %452 = vmatprep.mubr.msk.f32.mxu1 %vm595_vm0, %v596_v6  ;;  %v32_v8 = vld [vmem:[%s837_s1 + $0x20] sm:$0xff]  ;;  %v33_v9 = vld [vmem:[%s837_s1 + $0x28] sm:$0xff] }
   0x3   :  { %v494_v7 = vpack.c.bf16 %v31_v5, %v30_v2  ;;  %v122_v10 = vld [vmem:[%s839_s3] sm:$0xff]  ;;  %v123_v11 = vld [vmem:[%s839_s3 + $0x8] sm:$0xff]  ;;  %v124_v12 = vld [vmem:[%s839_s3 + $0x10] sm:$0xff]  ;;  %v497_v14 = vpack.c.bf16 %v33_v9, %v32_v8 }
   0x4   :  { %492 = vmatpush3.bf16.msra.mxu0 %v491_v4  ;;  %v125_v13 = vld [vmem:[%s839_s3 + $0x18] sm:$0xff]  ;;  %v515_v15 = vpack.c.bf16 %v123_v11, %v122_v10  ;;  %v34_v16 = vld [vmem:[%s837_s1 + $0x30] sm:$0xff]  ;;  %v126_v19 = vld [vmem:[%s839_s3 + $0x20] sm:$0xff] }
   0x5   :  { %493 = vmatprep.subr.bf16.mxu0 %v594_v3  ;;  %v35_v17 = vld [vmem:[%s837_s1 + $0x38] sm:$0xff]  ;;  %v518_v18 = vpack.c.bf16 %v125_v13, %v124_v12  ;;  %v127_v20 = vld [vmem:[%s839_s3 + $0x28] sm:$0xff] }
   0x6   :  { %516 = vmatpush3.bf16.msra.mxu1 %v515_v15 }
   0x7   :  { %517 = vmatprep.subr.bf16.mxu1 %v594_v3 }
   0x8   :  { %495 = vmatpush3.bf16.msra.mxu0 %v494_v7 }
   0x9   :  { %496 = vmatprep.subr.bf16.mxu0 %v594_v3 }
   0xa   :  { %12 = vsyncpa [#allocation3], 0  ;;  %v500_v21 = vpack.c.bf16 %v35_v17, %v34_v16  ;;  %v36_v22 = vld [vmem:[%s837_s1 + $0x40] sm:$0xff]  ;;  %v37_v23 = vld [vmem:[%s837_s1 + $0x48] sm:$0xff]  ;;  %519 = vmatpush3.bf16.msra.mxu1 %v518_v18  ;;  %v521_v24 = vpack.c.bf16 %v127_v20, %v126_v19 }
   0xb   :  { %520 = vmatprep.subr.bf16.mxu1 %v594_v3  ;;  %v128_v25 = vld [vmem:[%s839_s3 + $0x30] sm:$0xff]  ;;  %v129_v26 = vld [vmem:[%s839_s3 + $0x38] sm:$0xff]  ;;  %v503_v27 = vpack.c.bf16 %v37_v23, %v36_v22  ;;  %v130_v31 = vld [vmem:[%s839_s3 + $0x40] sm:$0xff] }
   0xc   :  { %498 = vmatpush3.bf16.msra.mxu0 %v497_v14  ;;  %v38_v28 = vld [vmem:[%s837_s1 + $0x50] sm:$0xff]  ;;  %v39_v29 = vld [vmem:[%s837_s1 + $0x58] sm:$0xff]  ;;  %v524_v30 = vpack.c.bf16 %v129_v26, %v128_v25  ;;  %v131_v32 = vld [vmem:[%s839_s3 + $0x48] sm:$0xff] }
   0xd   :  { %499 = vmatprep.subr.bf16.mxu0 %v594_v3  ;;  %v506_v33 = vpack.c.bf16 %v39_v29, %v38_v28  ;;  %v40_v34 = vld [vmem:[%s837_s1 + $0x60] sm:$0xff]  ;;  %v41_v35 = vld [vmem:[%s837_s1 + $0x68] sm:$0xff]  ;;  %v527_v36 = vpack.c.bf16 %v131_v32, %v130_v31  ;;  %v132_v37 = vld [vmem:[%s839_s3 + $0x50] sm:$0xff] }
   0xe   :  { %522 = vmatpush3.bf16.msra.mxu1 %v521_v24  ;;  %v133_v38 = vld [vmem:[%s839_s3 + $0x58] sm:$0xff]  ;;  %v509_v39 = vpack.c.bf16 %v41_v35, %v40_v34  ;;  %v42_v40 = vld [vmem:[%s837_s1 + $0x70] sm:$0xff]  ;;  %v134_v43 = vld [vmem:[%s839_s3 + $0x60] sm:$0xff] }
   0xf   :  { %523 = vmatprep.subr.bf16.mxu1 %v594_v3  ;;  %v43_v41 = vld [vmem:[%s837_s1 + $0x78] sm:$0xff]  ;;  %v530_v42 = vpack.c.bf16 %v133_v38, %v132_v37  ;;  %v135_v44 = vld [vmem:[%s839_s3 + $0x68] sm:$0xff]  ;;  %v27_v47 = vld [vmem:[%s836_s0] sm:$0xff] }
  0x10   :  { %501 = vmatpush3.bf16.msra.mxu0 %v500_v21  ;;  %v512_v45 = vpack.c.bf16 %v43_v41, %v42_v40  ;;  %v533_v46 = vpack.c.bf16 %v135_v44, %v134_v43  ;;  %v136_v48 = vld [vmem:[%s839_s3 + $0x70] sm:$0xff]  ;;  %v137_v49 = vld [vmem:[%s839_s3 + $0x78] sm:$0xff]  ;;  %v216_v51 = vld [vmem:[%s841_s5] sm:$0xff] }
  0x11   :  { %502 = vmatprep.subr.bf16.mxu0 %v594_v3  ;;  %v536_v50 = vpack.c.bf16 %v137_v49, %v136_v48  ;;  %v217_v52 = vld [vmem:[%s841_s5 + $0x8] sm:$0xff]  ;;  %v218_v53 = vld [vmem:[%s841_s5 + $0x10] sm:$0xff]  ;;  %v219_v55 = vld [vmem:[%s841_s5 + $0x18] sm:$0xff] }
  0x12   :  { %525 = vmatpush3.bf16.msra.mxu1 %v524_v30  ;;  %v539_v54 = vpack.c.bf16 %v217_v52, %v216_v51  ;;  %v542_v56 = vpack.c.bf16 %v219_v55, %v218_v53  ;;  %v220_v57 = vld [vmem:[%s841_s5 + $0x20] sm:$0xff]  ;;  %v221_v58 = vld [vmem:[%s841_s5 + $0x28] sm:$0xff]  ;;  %v222_v60 = vld [vmem:[%s841_s5 + $0x30] sm:$0xff] }
  0x13   :  { %526 = vmatprep.subr.bf16.mxu1 %v594_v3  ;;  %v545_v59 = vpack.c.bf16 %v221_v58, %v220_v57  ;;  %v223_v61 = vld [vmem:[%s841_s5 + $0x38] sm:$0xff]  ;;  %v224_v63 = vld [vmem:[%s841_s5 + $0x40] sm:$0xff]  ;;  %v225_v0 = vld [vmem:[%s841_s5 + $0x48] sm:$0xff] }
  0x14   :  { %504 = vmatpush3.bf16.msra.mxu0 %v503_v27  ;;  %v548_v62 = vpack.c.bf16 %v223_v61, %v222_v60  ;;  %v551_v1 = vpack.c.bf16 %v225_v0, %v224_v63  ;;  %v226_v2 = vld [vmem:[%s841_s5 + $0x50] sm:$0xff]  ;;  %v227_v4 = vld [vmem:[%s841_s5 + $0x58] sm:$0xff]  ;;  %v229_v7 = vld [vmem:[%s841_s5 + $0x68] sm:$0xff] }
  0x15   :  { %505 = vmatprep.subr.bf16.mxu0 %v594_v3  ;;  %v554_v5 = vpack.c.bf16 %v227_v4, %v226_v2  ;;  %v330_v9 = vld [vmem:[%s838_s2] ss:$0 sm:$0xff]  ;;  %v230_v14 = vld [vmem:[%s841_s5 + $0x70] sm:$0xff]  ;;  %v231_v15 = vld [vmem:[%s841_s5 + $0x78] sm:$0xff] }
  0x16   :  { %528 = vmatpush3.bf16.msra.mxu1 %v527_v36  ;;  %v560_v16 = vpack.c.bf16 %v231_v15, %v230_v14  ;;  %v332_v21 = vld [vmem:[%s842_s6] ss:$0 sm:$0xff] }
  0x17   :  { %529 = vmatprep.subr.bf16.mxu1 %v594_v3 }
  0x18   :  { %507 = vmatpush3.bf16.msra.mxu0 %v506_v33 }
  0x19   :  { %508 = vmatprep.subr.bf16.mxu0 %v594_v3 }
  0x1a   :  { %531 = vmatpush3.bf16.msra.mxu1 %v530_v42 }
  0x1b   :  { %532 = vmatprep.subr.bf16.mxu1 %v594_v3 }
  0x1c   :  { %510 = vmatpush3.bf16.msra.mxu0 %v509_v39 }
  0x1d   :  { %511 = vmatprep.subr.bf16.mxu0 %v594_v3 }
  0x1e   :  { %534 = vmatpush3.bf16.msra.mxu1 %v533_v46 }
  0x1f   :  { %535 = vmatprep.subr.bf16.mxu1 %v594_v3 }
  0x20   :  { %513 = vmatpush3.bf16.msra.mxu0 %v512_v45 }
  0x21   :  { %538 = vmatprep.subr.bf16.mxu0 %v594_v3 }
  0x22   :  { %537 = vmatpush3.bf16.msra.mxu1 %v536_v50 }
  0x23   :  { %418 = vmatmul.mubr.f32.vlgmr.msra.gmra.mrb[0].mxu0 %v27_v47 }
  0x24   :  { %487 = vmatprep.mubr.msk.f32.mxu0 %vm595_vm0, %v596_v6  ;;  %540 = vmatpush3.bf16.msra.mxu0 %v539_v54  ;;  %v228_v6 = vld [vmem:[%s841_s5 + $0x60] sm:$0xff]  ;;  %s597_s5 = smov [#allocation2]  }
  0x25   :  { %541 = vmatprep.subr.bf16.mxu0 %v594_v3  ;;  %v557_v8 = vpack.c.bf16 %v229_v7, %v228_v6  ;;  %s322_s29 = sshll.u32 %s597_s5, 4  ;;  %s323_s29 = int_to_ptr.vmem [resolvable:$true] %s322_s29 }
  0x26   :  { %p575_p1 = scmp.lt.s32.totalorder %s323_s29, %s323_s29 }
  0x28   :  { %543 = vmatpush3.bf16.msra.mxu0 %v542_v56 }
  0x29   :  { %544 = vmatprep.subr.bf16.mxu0 %v594_v3 }
  0x2c   :  { %546 = vmatpush3.bf16.msra.mxu0 %v545_v59 }
  0x2d   :  { %547 = vmatprep.subr.bf16.mxu0 %v594_v3 }
  0x30   :  { %549 = vmatpush3.bf16.msra.mxu0 %v548_v62 }
  0x31   :  { %550 = vmatprep.subr.bf16.mxu0 %v594_v3 }
  0x34   :  { %552 = vmatpush3.bf16.msra.mxu0 %v551_v1 }
  0x35   :  { %553 = vmatprep.subr.bf16.mxu0 %v594_v3 }
  0x38   :  { %555 = vmatpush3.bf16.msra.mxu0 %v554_v5 }
  0x39   :  { %556 = vmatprep.subr.bf16.mxu0 %v594_v3 }
  0x3c   :  { %558 = vmatpush3.bf16.msra.mxu0 %v557_v8 }
  0x3d   :  { %559 = vmatprep.subr.bf16.mxu0 %v594_v3  ;;  %v331_v3 = vld [vmem:[%s840_s4] ss:$0 sm:$0xff]  ;;  %s570_s4 = scalar_lea.vmem %s323_s29, 128 }
  0x3e   :  { %p571_p0 = scmp.ne.s32.totalorder %s323_s29, %s570_s4  ;;  %p576_p2 = scmp.lt.s32.totalorder %s570_s4, %s570_s4 }
  0x40   :  { %561 = vmatpush3.bf16.msra.mxu0 %v560_v16  ;;  %p577_p3 = por %p576_p2, %p575_p1 }
  0x42   :  { %p578_p4 = pnand %p577_p3, %p571_p0 }
  0xf6   :  { %v117_v10 = vpop.f32.mrb[0].mxu0 }
  0xf7   :  { %v118_v11 = vadd.f32 %v330_v9, %v117_v10  ;;  %v419_v12 = vpop.f32.mrb[1].mxu0 }
  0xf9   :  { %v121_v13 = vmax.f32 %v118_v11, 0.0 }
  0xfb   :  { %453 = vmatmul.mubr.f32.vlgmr.msra.gmra.mrb[0].mxu1 %v121_v13 }
 0x1ce   :  { %v211_v17 = vpop.f32.mrb[0].mxu1 }
 0x1cf   :  { %v212_v18 = vadd.f32 %v331_v3, %v211_v17  ;;  %v454_v19 = vpop.f32.mrb[1].mxu1 }
 0x1d1   :  { %v215_v20 = vmax.f32 %v212_v18, 0.0 }
 0x1d3   :  { %488 = vmatmul.mubr.f32.vlgmr.msra.gmra.mrb[2].mxu0 %v215_v20 }
 0x2a6   :  { %v305_v22 = vpop.f32.mrb[2].mxu0 }
 0x2a7   :  { %v306_v23 = vadd.f32 %v332_v21, %v305_v22  ;;  %v489_v24 = vpop.f32.mrb[3].mxu0 }
 0x2a9   :  { %v333_v25 = vmul.f32 -1.442695, %v306_v23 }
 0x2ab   :  { %566 = vpow2.f32 %v333_v25 }
 0x2b5   :  { %v567_v26 = vpop.eup %566 }
 0x2b6   :  { %v312_v27 = vadd.f32 1.0, %v567_v26 }
 0x2b8   :  { %568 = vrcp.f32 %v312_v27 }
 0x2c2   :  { %v569_v28 = vpop.eup %568 }
 0x2c3   :  { %315 = vst [vmem:[#allocation2] sm:$0xff] %v569_v28 }
 0x2c4   :  { %581 = shalt.err (!%p578_p4)
}
 0x2c5   :  { %s582_s8 = scalar_lea.hbm %s843_s7, 128 }
 0x2c6   :  { %p583_p5 = scmp.ne.s32.totalorder %s843_s7, %s582_s8  ;;  %p586_p6 = scmp.lt.u32.totalorder %s582_s8, %s843_s7 }
 0x2c8   :  { %p588_p7 = pnand %p586_p6, %p583_p5 }
 0x2ca   :  { %591 = shalt.err (!%p588_p7)
}
 0x2cb   :  { %325 = dma.vmem_to_hbm [thread:$0]  %s323_s29, 128, %s843_s7, [#allocation3]  }
 0x2cc   :  { %592 = dma.done.wait [#allocation3], 128  }
 0x2cd   :  { %593 = vsyncadd [#allocation3], 4294967168 }
 0x2ce   :  { %329 = vsyncpa [#allocation3], 1 }

</bundles_post_ra>
